<compile_context>
chip_gen: v7x
topology: tpu7x:2x2x1
jax: 0.10.0
libtpu: 0.0.40
codegen_flags: <defaults>
</compile_context>

<pallas_src>
import jax
import jax.numpy as jnp
import numpy as np
from jax.experimental import pallas as pl
from jax.experimental.pallas import tpu as pltpu


def _round_up(x, m):
    return (x + m - 1) // m * m


# ---------------------------------------------------------------------------
# Fused expert-sum kernel
#   acc += ( silu(x @ W1_e[:, i-tile]) * (x @ W3_e[:, i-tile]) * rw_e ) @ W2_e[i-tile, :]
# accumulated over experts e and inter tiles i, per token tile.
# ---------------------------------------------------------------------------
def moe_expert_kernel(x_ref, w1_ref, w3_ref, w2_ref, rw_ref, o_ref, acc_ref):
    e = pl.program_id(1)
    i = pl.program_id(2)

    @pl.when(jnp.logical_and(e == 0, i == 0))
    def _():
        acc_ref[...] = jnp.zeros_like(acc_ref)

    x = x_ref[...]                      # (tm, D)   bf16
    w1 = w1_ref[0]                      # (D, ti)   bf16
    w3 = w3_ref[0]                      # (D, ti)   bf16
    w2 = w2_ref[0]                      # (ti, D)   bf16
    rw = rw_ref[0]                      # (tm, 1)   fp32 routing weight for this expert

    # MXU matmuls in bf16, fp32 accumulate.
    h1 = jnp.dot(x, w1, preferred_element_type=jnp.float32)   # (tm, ti) fp32
    h3 = jnp.dot(x, w3, preferred_element_type=jnp.float32)   # (tm, ti) fp32

    # fp32 elementwise SiLU (VPU/EUP; v5e has no bf16 VPU path).
    h = (h1 * jax.nn.sigmoid(h1)) * h3                         # (tm, ti) fp32

    # Scale the (tm, ti) intermediate (cheaper than scaling the (tm, D) output)
    # and hard-mask un-routed experts so 0*inf can never leak into the sum.
    h = jnp.where(rw != 0.0, h * rw, 0.0).astype(x.dtype)      # bf16 for MXU

    acc_ref[...] += jnp.dot(h, w2, preferred_element_type=jnp.float32)

    @pl.when(
        jnp.logical_and(
            e == pl.num_programs(1) - 1, i == pl.num_programs(2) - 1
        )
    )
    def _():
        o_ref[...] = acc_ref[...].astype(o_ref.dtype)


def _moe_expert_sum(xb, w1t, w3t, w2t, rw, *, tm, ti, out_dtype):
    # xb: (Tp, D) bf16; w1t/w3t: (E_all, D, I) bf16; w2t: (E_all, I, D) bf16;
    # rw: (E_all, Tp, 1) fp32
    Tp, D = xb.shape
    E_all, _, I = w1t.shape
    grid = (Tp // tm, E_all, I // ti)

    return pl.pallas_call(
        moe_expert_kernel,
        out_shape=jax.ShapeDtypeStruct((Tp, D), out_dtype),
        grid_spec=pltpu.PrefetchScalarGridSpec(
            num_scalar_prefetch=0,
            grid=grid,
            in_specs=[
                pl.BlockSpec((tm, D), lambda t, e, i: (t, 0)),
                pl.BlockSpec((1, D, ti), lambda t, e, i: (e, 0, i)),
                pl.BlockSpec((1, D, ti), lambda t, e, i: (e, 0, i)),
                pl.BlockSpec((1, ti, D), lambda t, e, i: (e, i, 0)),
                pl.BlockSpec((1, tm, 1), lambda t, e, i: (e, t, 0)),
            ],
            out_specs=pl.BlockSpec((tm, D), lambda t, e, i: (t, 0)),
            scratch_shapes=[pltpu.VMEM((tm, D), jnp.float32)],
        ),
        compiler_params=pltpu.CompilerParams(
            # token axis parallel -> both TensorCores get work on v7x /
            # megacore; expert + inter axes are accumulator reductions.
            dimension_semantics=("parallel", "arbitrary", "arbitrary"),
            vmem_limit_bytes=64 * 1024 * 1024,
        ),
    )(xb, w1t, w3t, w2t, rw)


# ---------------------------------------------------------------------------
# Full MoE forward
# ---------------------------------------------------------------------------
def moe_forward(x, params, topk, route_scale=1.0, tm=None, ti=None):
    shape = x.shape
    dim = shape[-1]
    xf = x.reshape(-1, dim)
    T = xf.shape[0]
    E = params["gate_w"].shape[0]
    I = params["w1s"].shape[1]

    # ---- Gate: softmax score_func, n_groups == 1, no bias (dim != 7168). ----
    # Kept in XLA: O(T*E*D) routing glue, fuses with the routing-table build.
    logits = jnp.dot(
        xf.astype(jnp.float32),
        params["gate_w"].astype(jnp.float32).T,
        preferred_element_type=jnp.float32,
    )
    scores = jax.nn.softmax(logits, axis=-1)
    weights, indices = jax.lax.top_k(scores, topk)          # (T, k)
    weights = (weights * route_scale).astype(jnp.float32)

    # ---- Fold the shared-expert MLP into n_shared extra experts (weight 1). --
    sw1, sw3, sw2 = params["sw1"], params["sw3"], params["sw2"]
    SI = sw1.shape[0]
    assert SI % I == 0, "shared inter dim must be a multiple of moe_inter_dim"
    n_sh = SI // I
    w1_all = jnp.concatenate([params["w1s"], sw1.reshape(n_sh, I, dim)], axis=0)
    w3_all = jnp.concatenate([params["w3s"], sw3.reshape(n_sh, I, dim)], axis=0)
    w2_all = jnp.concatenate(
        [params["w2s"], jnp.transpose(sw2.reshape(dim, n_sh, I), (1, 0, 2))],
        axis=0,
    )
    E_all = E + n_sh

    # One-time transpose to the MXU-natural (K, N) layouts + bf16 cast.
    w1t = jnp.transpose(w1_all, (0, 2, 1)).astype(jnp.bfloat16)   # (E_all, D, I)
    w3t = jnp.transpose(w3_all, (0, 2, 1)).astype(jnp.bfloat16)   # (E_all, D, I)
    w2t = jnp.transpose(w2_all, (0, 2, 1)).astype(jnp.bfloat16)   # (E_all, I, D)

    # ---- Token tiling / padding. ----
    if tm is None:
        tm = 128 if T >= 128 else _round_up(T, 16)
    Tp = _round_up(T, tm)
    xp = xf if Tp == T else jnp.pad(xf, ((0, Tp - T), (0, 0)))
    xb = xp.astype(jnp.bfloat16)

    # ---- Inter-dim tiling (bounds VMEM for realistic D/I; 256 fits v7x's
    #      64 MiB with double-buffered weight tiles; raise on v6e if desired).
    if ti is None:
        if I % 256 == 0:
            ti = 256
        elif I % 128 == 0:
            ti = 128
        else:
            ti = I

    # ---- Dense routing-weight table, scatter (no one_hot blow-up), laid out
    #      (E_all, Tp, 1) so the kernel never transposes. Shared experts = 1.
    rw = jnp.zeros((Tp, E_all), jnp.float32)
    rw = rw.at[jnp.arange(T)[:, None], indices].add(weights)
    rw = rw.at[:, E:].set(1.0)          # shared experts always active
    rw = jnp.transpose(rw)[:, :, None]  # (E_all, Tp, 1)

    out = _moe_expert_sum(
        xb, w1t, w3t, w2t, rw, tm=tm, ti=ti, out_dtype=jnp.bfloat16
    )
    return out[:T].astype(x.dtype).reshape(shape)


# ---------------------------------------------------------------------------
# Pure-JAX fp32 reference (mirrors the PyTorch module) for correctness check
# ---------------------------------------------------------------------------
def moe_ref(x, params, topk, route_scale=1.0):
    shape = x.shape
    dim = shape[-1]
    xf = x.reshape(-1, dim).astype(jnp.float32)
    T = xf.shape[0]
    E = params["gate_w"].shape[0]

    logits = xf @ params["gate_w"].T
    scores = jax.nn.softmax(logits, axis=-1)
    weights, indices = jax.lax.top_k(scores, topk)
    weights = weights * route_scale
    dense_rw = jnp.zeros((T, E), jnp.float32)
    dense_rw = dense_rw.at[jnp.arange(T)[:, None], indices].add(weights)

    y = jnp.zeros_like(xf)
    for e in range(E):
        h1 = xf @ params["w1s"][e].T
        h3 = xf @ params["w3s"][e].T
        y = y + ((jax.nn.silu(h1) * h3) @ params["w2s"][e].T) * dense_rw[:, e:e + 1]

    h1 = xf @ params["sw1"].T
    h3 = xf @ params["sw3"].T
    z = (jax.nn.silu(h1) * h3) @ params["sw2"].T
    return (y + z).astype(x.dtype).reshape(shape)


# ---------------------------------------------------------------------------
if __name__ == "__main__":
    # Small ModelArgs-consistent shapes
    B, S = 2, 8
    dim = 32
    moe_inter_dim = 64
    n_routed_experts = 8
    n_activated_experts = 2
    n_shared_experts = 2
    shared_inter = n_shared_experts * moe_inter_dim

    key = jax.random.PRNGKey(0)
    ks = jax.random.split(key, 8)

    def init(k, shape, fan_in):
        return jax.random.normal(k, shape, jnp.float32) / np.sqrt(fan_in)

    params = {
        "gate_w": init(ks[1], (n_routed_experts, dim), dim),
        "w1s": init(ks[2], (n_routed_experts, moe_inter_dim, dim), dim),
        "w3s": init(ks[3], (n_routed_experts, moe_inter_dim, dim), dim),
        "w2s": init(ks[4], (n_routed_experts, dim, moe_inter_dim), moe_inter_dim),
        "sw1": init(ks[5], (shared_inter, dim), dim),
        "sw3": init(ks[6], (shared_inter, dim), dim),
        "sw2": init(ks[7], (dim, shared_inter), shared_inter),
    }

    x = jax.random.normal(ks[0], (B, S, dim), jnp.float32)

    out = moe_forward(x, params, topk=n_activated_experts)
    out = jax.block_until_ready(out)

    ref = moe_ref(x, params, topk=n_activated_experts)
    np.testing.assert_allclose(
        np.asarray(out, dtype=np.float32),
        np.asarray(ref, dtype=np.float32),
        rtol=2e-2,
        atol=3e-2,
    )

    print("KERNEL_OK")
</pallas_src>

<mosaic_0001>
module attributes {stable_mosaic.version = 11 : i64} {
  func.func @moe_expert_kernel(%arg0: i32, %arg1: i32, %arg2: i32, %arg3: memref<16x32xbf16, #tpu.memory_space<vmem>>, %arg4: memref<1x32x64xbf16, #tpu.memory_space<vmem>>, %arg5: memref<1x32x64xbf16, #tpu.memory_space<vmem>>, %arg6: memref<1x64x32xbf16, #tpu.memory_space<vmem>>, %arg7: memref<1x16x1xf32, #tpu.memory_space<vmem>>, %arg8: memref<16x32xbf16, #tpu.memory_space<vmem>>, %arg9: memref<16x32xf32, #tpu.memory_space<vmem>>) attributes {dimension_semantics = [#tpu.dimension_semantics<parallel>, #tpu.dimension_semantics<arbitrary>, #tpu.dimension_semantics<arbitrary>], iteration_bounds = array<i64: 1, 10, 1>, scalar_prefetch = 0 : i64, scratch_operands = 1 : i64, tpu.core_type = #tpu.core_type<tc>, window_params = [{transform_indices = @transform_0, window_bounds = array<i64: 16, 32>}, {transform_indices = @transform_1, window_bounds = array<i64: 1, 32, 64>}, {transform_indices = @transform_2, window_bounds = array<i64: 1, 32, 64>}, {transform_indices = @transform_3, window_bounds = array<i64: 1, 64, 32>}, {transform_indices = @transform_4, window_bounds = array<i64: 1, 16, 1>}, {transform_indices = @transform_5, window_bounds = array<i64: 16, 32>}]} {
    %c0_i32 = arith.constant 0 : i32
    %0 = arith.cmpi eq, %arg1, %c0_i32 : i32
    %c0_i32_0 = arith.constant 0 : i32
    %1 = arith.cmpi eq, %arg2, %c0_i32_0 : i32
    %2 = arith.andi %0, %1 : i1
    %3 = arith.extui %2 : i1 to i32
    %c0_i32_1 = arith.constant 0 : i32
    %4 = arith.cmpi ne, %3, %c0_i32_1 : i32
    scf.if %4 {
      %cst_26 = arith.constant 0.000000e+00 : f32
      %41 = vector.broadcast %cst_26 : f32 to vector<16x32xf32>
      %c0_27 = arith.constant 0 : index
      %c0_28 = arith.constant 0 : index
      %42 = vector.load %arg9[%c0_27, %c0_28] : memref<16x32xf32, #tpu.memory_space<vmem>>, vector<16x32xf32>
      tpu.vector_store %arg9[%c0_27, %c0_28], %41 {strides = array<i32>} : memref<16x32xf32, #tpu.memory_space<vmem>>, vector<16x32xf32>,
    } else {
    }
    %c0 = arith.constant 0 : index
    %c0_2 = arith.constant 0 : index
    %5 = vector.load %arg3[%c0, %c0_2] : memref<16x32xbf16, #tpu.memory_space<vmem>>, vector<16x32xbf16>
    %c0_3 = arith.constant 0 : index
    %c0_4 = arith.constant 0 : index
    %c0_5 = arith.constant 0 : index
    %6 = vector.load %arg4[%c0_3, %c0_4, %c0_5] : memref<1x32x64xbf16, #tpu.memory_space<vmem>>, vector<1x32x64xbf16>
    %7 = vector.shape_cast %6 : vector<1x32x64xbf16> to vector<32x64xbf16>
    %c0_6 = arith.constant 0 : index
    %c0_7 = arith.constant 0 : index
    %c0_8 = arith.constant 0 : index
    %8 = vector.load %arg5[%c0_6, %c0_7, %c0_8] : memref<1x32x64xbf16, #tpu.memory_space<vmem>>, vector<1x32x64xbf16>
    %9 = vector.shape_cast %8 : vector<1x32x64xbf16> to vector<32x64xbf16>
    %c0_9 = arith.constant 0 : index
    %c0_10 = arith.constant 0 : index
    %c0_11 = arith.constant 0 : index
    %10 = vector.load %arg6[%c0_9, %c0_10, %c0_11] : memref<1x64x32xbf16, #tpu.memory_space<vmem>>, vector<1x64x32xbf16>
    %11 = vector.shape_cast %10 : vector<1x64x32xbf16> to vector<64x32xbf16>
    %c0_12 = arith.constant 0 : index
    %c0_13 = arith.constant 0 : index
    %c0_14 = arith.constant 0 : index
    %12 = vector.load %arg7[%c0_12, %c0_13, %c0_14] : memref<1x16x1xf32, #tpu.memory_space<vmem>>, vector<1x16x1xf32>
    %13 = vector.shape_cast %12 : vector<1x16x1xf32> to vector<16x1xf32>
    %cst = arith.constant dense<0.000000e+00> : vector<16x64xf32>
    %14 = tpu.matmul %5, %7, %cst {dimension_numbers = #tpu.dot_dimension_numbers<[1], [0], [0], [1], [0, 0, 1, 1], [], []>} : vector<16x32xbf16>, vector<32x64xbf16>, vector<16x64xf32> -> vector<16x64xf32>
    %cst_15 = arith.constant dense<0.000000e+00> : vector<16x64xf32>
    %15 = tpu.matmul %5, %9, %cst_15 {dimension_numbers = #tpu.dot_dimension_numbers<[1], [0], [0], [1], [0, 0, 1, 1], [], []>} : vector<16x32xbf16>, vector<32x64xbf16>, vector<16x64xf32> -> vector<16x64xf32>
    %16 = arith.negf %14 : vector<16x64xf32>
    %17 = math.exp %16 : vector<16x64xf32>
    %cst_16 = arith.constant 1.000000e+00 : f32
    %18 = vector.broadcast %cst_16 : f32 to vector<16x64xf32>
    %19 = arith.addf %18, %17 : vector<16x64xf32>
    %20 = arith.divf %18, %19 : vector<16x64xf32>
    %21 = arith.mulf %14, %20 : vector<16x64xf32>
    %22 = arith.mulf %21, %15 : vector<16x64xf32>
    %cst_17 = arith.constant 0.000000e+00 : f32
    %23 = vector.broadcast %cst_17 : f32 to vector<16x1xf32>
    %24 = arith.cmpf one, %13, %23 : vector<16x1xf32>
    %25 = vector.broadcast %13 : vector<16x1xf32> to vector<16x64xf32>
    %26 = arith.mulf %22, %25 : vector<16x64xf32>
    %cst_18 = arith.constant 0.000000e+00 : f32
    %27 = vector.shape_cast %24 : vector<16x1xi1> to vector<16x1xi1>
    %28 = vector.broadcast %27 : vector<16x1xi1> to vector<16x64xi1>
    %29 = vector.broadcast %cst_18 : f32 to vector<16x64xf32>
    %30 = arith.select %28, %26, %29 : vector<16x64xi1>, vector<16x64xf32>
    %31 = arith.truncf %30 : vector<16x64xf32> to vector<16x64xbf16>
    %c0_19 = arith.constant 0 : index
    %c0_20 = arith.constant 0 : index
    %32 = vector.load %arg9[%c0_19, %c0_20] : memref<16x32xf32, #tpu.memory_space<vmem>>, vector<16x32xf32>
    %cst_21 = arith.constant dense<0.000000e+00> : vector<16x32xf32>
    %33 = tpu.matmul %31, %11, %cst_21 {dimension_numbers = #tpu.dot_dimension_numbers<[1], [0], [0], [1], [0, 0, 1, 1], [], []>} : vector<16x64xbf16>, vector<64x32xbf16>, vector<16x32xf32> -> vector<16x32xf32>
    %34 = arith.addf %32, %33 : vector<16x32xf32>
    %c0_22 = arith.constant 0 : index
    %c0_23 = arith.constant 0 : index
    %35 = vector.load %arg9[%c0_22, %c0_23] : memref<16x32xf32, #tpu.memory_space<vmem>>, vector<16x32xf32>
    tpu.vector_store %arg9[%c0_22, %c0_23], %34 {strides = array<i32>} : memref<16x32xf32, #tpu.memory_space<vmem>>, vector<16x32xf32>,
    %c9_i32 = arith.constant 9 : i32
    %36 = arith.cmpi eq, %arg1, %c9_i32 : i32
    %c0_i32_24 = arith.constant 0 : i32
    %37 = arith.cmpi eq, %arg2, %c0_i32_24 : i32
    %38 = arith.andi %36, %37 : i1
    %39 = arith.extui %38 : i1 to i32
    %c0_i32_25 = arith.constant 0 : i32
    %40 = arith.cmpi ne, %39, %c0_i32_25 : i32
    scf.if %40 {
      %c0_26 = arith.constant 0 : index
      %c0_27 = arith.constant 0 : index
      %41 = vector.load %arg9[%c0_26, %c0_27] : memref<16x32xf32, #tpu.memory_space<vmem>>, vector<16x32xf32>
      %42 = arith.truncf %41 : vector<16x32xf32> to vector<16x32xbf16>
      %c0_28 = arith.constant 0 : index
      %c0_29 = arith.constant 0 : index
      %43 = vector.load %arg8[%c0_28, %c0_29] : memref<16x32xbf16, #tpu.memory_space<vmem>>, vector<16x32xbf16>
      tpu.vector_store %arg8[%c0_28, %c0_29], %42 {strides = array<i32>} : memref<16x32xbf16, #tpu.memory_space<vmem>>, vector<16x32xbf16>,
    } else {
    }
    return
  }
  func.func @transform_0(%arg0: i32, %arg1: i32, %arg2: i32) -> (i32, i32) {
    %c0_i32 = arith.constant 0 : i32
    %c0_i32_0 = arith.constant 0 : i32
    return %arg0, %c0_i32 : i32, i32
  }
  func.func @transform_1(%arg0: i32, %arg1: i32, %arg2: i32) -> (i32, i32, i32) {
    %c0_i32 = arith.constant 0 : i32
    %c0_i32_0 = arith.constant 0 : i32
    return %arg1, %c0_i32, %arg2 : i32, i32, i32
  }
  func.func @transform_2(%arg0: i32, %arg1: i32, %arg2: i32) -> (i32, i32, i32) {
    %c0_i32 = arith.constant 0 : i32
    %c0_i32_0 = arith.constant 0 : i32
    return %arg1, %c0_i32, %arg2 : i32, i32, i32
  }
  func.func @transform_3(%arg0: i32, %arg1: i32, %arg2: i32) -> (i32, i32, i32) {
    %c0_i32 = arith.constant 0 : i32
    %c0_i32_0 = arith.constant 0 : i32
    return %arg1, %arg2, %c0_i32 : i32, i32, i32
  }
  func.func @transform_4(%arg0: i32, %arg1: i32, %arg2: i32) -> (i32, i32, i32) {
    %c0_i32 = arith.constant 0 : i32
    %c0_i32_0 = arith.constant 0 : i32
    return %arg1, %arg0, %c0_i32 : i32, i32, i32
  }
  func.func @transform_5(%arg0: i32, %arg1: i32, %arg2: i32) -> (i32, i32) {
    %c0_i32 = arith.constant 0 : i32
    %c0_i32_0 = arith.constant 0 : i32
    return %arg0, %c0_i32 : i32, i32
  }
}

</mosaic_0001>

<bundles_post_ra>
// kernel: tpu_custom_call.1
= control target key start
LH: loop header
LB: loop body
LE: loop exit
PB: predicated region body
PF: predicated region fallthrough
CT: control target
= control target key end

     0   :  { %s1688_s0 = inlined_call_operand.hbm [shape: bf16[16,32], index: 0, kind: input, shape index: {}]   ;;  %s1689_s1 = inlined_call_operand.hbm [shape: bf16[10,32,64], index: 1, kind: input, shape index: {}]   ;;  %s1690_s2 = inlined_call_operand.hbm [shape: bf16[10,32,64], index: 2, kind: input, shape index: {}]   ;;  %s1691_s3 = inlined_call_operand.hbm [shape: bf16[10,64,32], index: 3, kind: input, shape index: {}]   ;;  %s1692_s4 = inlined_call_operand.hbm [shape: f32[10,16,1], index: 4, kind: input, shape index: {}]   ;;  %s1693_s5 = inlined_call_operand.hbm [shape: bf16[16,32], index: 5, kind: output, shape index: {}]  }
   0x1   :  { %1708 = sst [smem:[#allocation21_spill]] %s1689_s1 }
   0x2   :  { %1709 = sst [smem:[#allocation22_spill]] %s1690_s2 }
   0x3   :  { %1710 = sst [smem:[#allocation23_spill]] %s1691_s3 }
   0x4   :  { %10 = vsyncpa [#allocation4], 0 }
   0x5   :  { %11 = vsyncpa [#allocation7], 0 }
   0x6   :  { %13 = vsyncpa [#allocation7 + $0x1], 0 }
   0x7   :  { %14 = vsyncpa [#allocation10], 0 }
   0x8   :  { %16 = vsyncpa [#allocation10 + $0x1], 0 }
   0x9   :  { %17 = vsyncpa [#allocation5], 0  ;;  %s1346_s18 = smov 0   ;;  %s1348_s19 = smov 0  }
   0xa   :  { %s1350_s20 = smov 0   ;;  %s1352_s21 = smov 0  }
   0xb   :  { %s1354_s22 = smov 0   ;;  %s1356_s23 = smov 0  }
   0xc LB: > { %1711 = sst [smem:[#allocation17_spill]] %s1286_s20  ;;  %s38_s24 = sadd.s32 1, %s1294_s22  ;;  %s1298_s23 = sphi %s1356_s23, %s23_s23   ;;  %s1294_s22 = sphi %s1354_s22, %s1736_s22   ;;  %s1290_s21 = sphi %s1352_s21, %s1735_s21   ;;  %s1286_s20 = sphi %s1350_s20, %s1734_s20   ;;  %s1282_s19 = sphi %s1348_s19, %s1738_s19   ;;  %s1278_s18 = sphi %s1346_s18, %s1737_s18  }
   0xd   : > { %1712 = sst [smem:[#allocation18_spill]] %s1294_s22  ;;  %s77_s25 = sadd.s32 1, %s1286_s20 }
   0xe   : > { %p40_p0 = scmp.ge.s32.totalorder %s38_s24, 10  ;;  %p84_p1 = scmp.ne.s32.totalorder %s1286_s20, %s1282_s19 }
   0xf   : > { %p85_p2 = scmp.eq.s32.totalorder %s1298_s23, 0  ;;  %p979_p5 = scmp.lt.s32.totalorder %s1298_s23, 10 }
  0x10   : > { %s1740_s24 = smov (%p40_p0, %s38_s24), 0  ;;  %s240_s28 = sand.u32 1, %s1298_s23  }
  0x11   : > { %1713 = sst [smem:[#allocation19_spill]] %s1740_s24  ;;  %p1383_p3 = por %p85_p2, %p84_p1 }
  0x12   : > { %s72_s27 = ssub.s32 %s1294_s22, %s1740_s24  ;;  %s242_s29 = sand.u32 1, %s1286_s20  }
  0x13   : > { %p75_p4 = scmp.eq.s32.totalorder %s72_s27, 0  ;;  %s1395_s6 = sshll.u32 %s242_s29, 4 }
  0x14   : > { %s1398_s7 = sshll.u32 %s1294_s22, 8  ;;  %s1716_s1 = sld [smem:[#allocation21_spill]] }
  0x15   : > { %s1393_s30 = scalar_select %p75_p4, %s1286_s20, %s77_s25  }
  0x16   : > { %s244_s11 = scalar_lea.vmem [#allocation6], %s1395_s6  ;;  %p1411_p6 = pnand %p979_p5, %p1383_p3 }
  0x17   : > { %1715 = sst [smem:[#allocation20_spill]] %s1393_s30  ;;  %s252_s12 = sshll.u32 %s244_s11, 4  ;;  %s1407_s12 = int_to_ptr.vmem [resolvable:$true] %s252_s12 }
  0x18   : > { %s1717_s13 = scalar_select %p1411_p6, 1, 0 }
  0x19   : > { %s1415_s14 = sshll.u32 %s242_s29, 5  ;;  %s1419_s15 = scalar_lea.sflag [#allocation7], %s240_s28 }
  0x1a   : > { %s1404_s10 = scalar_lea.hbm %s1716_s1, %s1398_s7  ;;  %p1425_p8 = pneg %p1411_p6 }
  0x1b   : > { %s1062_s16 = scalar_lea.hbm %s1404_s10, 256  ;;  %s1067_s27 = scalar_lea.hbm %s1716_s1, 2560 }
  0x1c   : > { %p1063_p7 = scmp.ne.s32.totalorder %s1404_s10, %s1062_s16  ;;  %p1068_p11 = scmp.lt.u32.totalorder %s1404_s10, %s1716_s1 }
  0x1d   : > { %s1718_s17 = scalar_select %p1425_p8, 1, 0 }
  0x1e   : > { %p1065_p9 = pnand %p1425_p8, %p1063_p7  ;;  %p1069_p12 = scmp.lt.u32.totalorder %s1067_s27, %s1062_s16 }
  0x1f   : > { %p1071_p0 = scmp.lt.u32.totalorder %s1062_s16, %s1404_s10 }
  0x20   : > { %p1066_p10 = pneg %p1065_p9  ;;  %p1070_p13 = por %p1069_p12, %p1068_p11 }
  0x22   : > { %p1072_p1 = por %p1071_p0, %p1070_p13 }
  0x24   : > { %p1073_p2 = pnand %p1072_p1, %p1066_p10 }
  0x26   : > { %1076 = shalt.err (!%p1073_p2)
}
  0x27   : > { %s1077_s9 = scalar_lea.vmem %s1407_s12, 256  ;;  %s1300_s11 = smov [#allocation6]  }
  0x28   : > { %p1078_p3 = scmp.ne.s32.totalorder %s1407_s12, %s1077_s9  ;;  %s1082_s25 = sshll.u32 %s1300_s11, 4  ;;  %s1083_s25 = int_to_ptr.vmem [resolvable:$false] %s1082_s25 }
  0x29   : > { %s1084_s26 = scalar_lea.vmem %s1083_s25, 512  ;;  %p1085_p7 = scmp.lt.s32.totalorder %s1407_s12, %s1083_s25 }
  0x2a   : > { %p1080_p4 = pnand %p1078_p3, %p1425_p8  ;;  %p1086_p9 = scmp.lt.s32.totalorder %s1084_s26, %s1077_s9 }
  0x2c   : > { %p1081_p5 = pneg %p1080_p4  ;;  %p1087_p11 = por %p1086_p9, %p1085_p7 }
  0x2e   : > { %p1088_p12 = pnand %p1087_p11, %p1081_p5 }
  0x30   : > { %1091 = shalt.err (!%p1088_p12)
}
  0x31   : > { %s1695_s16 = smov 64   ;;  %s1697_s27 = smov 4  }
  0x32   : > { %968 = dma.hbm_to_vmem [thread:$0]  (!%p1411_p6), %s1404_s10, 256, %s1407_s12, %s1419_s15, %s1695_s16, %s1695_s16, %s1697_s27  }
  0x33   : > { %s900_s29 = sshll.u32 %s1294_s22, 9  ;;  %s288_s8 = scalar_lea.vmem [#allocation9], %s1415_s14 }
  0x34   : > { %s297_s9 = sshll.u32 %s288_s8, 4  ;;  %s1719_s3 = sld [smem:[#allocation23_spill]]  ;;  %s1459_s9 = int_to_ptr.vmem [resolvable:$true] %s297_s9 }
  0x35   : > { %s1463_s1 = scalar_lea.sflag [#allocation10], %s240_s28 }
  0x3a   : > { %s1457_s26 = scalar_lea.hbm %s1719_s3, %s900_s29  ;;  %s1097_s14 = scalar_lea.hbm %s1719_s3, 5120 }
  0x3b   : > { %s1092_s24 = scalar_lea.hbm %s1457_s26, 512  ;;  %p1098_p1 = scmp.lt.u32.totalorder %s1457_s26, %s1719_s3 }
  0x3c   : > { %p1093_p10 = scmp.ne.s32.totalorder %s1457_s26, %s1092_s24  ;;  %p1099_p2 = scmp.lt.u32.totalorder %s1097_s14, %s1092_s24 }
  0x3d   : > { %p1101_p4 = scmp.lt.u32.totalorder %s1092_s24, %s1457_s26 }
  0x3e   : > { %p1095_p13 = pnand %p1093_p10, %p1425_p8  ;;  %p1100_p3 = por %p1099_p2, %p1098_p1 }
  0x40   : > { %p1096_p0 = pneg %p1095_p13  ;;  %p1102_p5 = por %p1101_p4, %p1100_p3 }
  0x42   : > { %p1103_p7 = pnand %p1102_p5, %p1096_p0 }
  0x44   : > { %1106 = shalt.err (!%p1103_p7)
}
  0x45   : > { %s1107_s28 = scalar_lea.vmem %s1459_s9, 512  ;;  %s1303_s11 = smov [#allocation9]  }
  0x46   : > { %p1108_p9 = scmp.ne.s32.totalorder %s1459_s9, %s1107_s28  ;;  %s1112_s25 = sshll.u32 %s1303_s11, 4  ;;  %s1113_s25 = int_to_ptr.vmem [resolvable:$false] %s1112_s25 }
  0x47   : > { %s1114_s10 = scalar_lea.vmem %s1113_s25, 1024  ;;  %p1115_p10 = scmp.lt.s32.totalorder %s1459_s9, %s1113_s25 }
  0x48   : > { %p1110_p11 = pnand %p1108_p9, %p1425_p8  ;;  %p1116_p13 = scmp.lt.s32.totalorder %s1114_s10, %s1107_s28 }
  0x4a   : > { %p1111_p12 = pneg %p1110_p11  ;;  %p1117_p1 = por %p1116_p13, %p1115_p10 }
  0x4c   : > { %p1118_p2 = pnand %p1117_p1, %p1111_p12 }
  0x4e   : > { %1121 = shalt.err (!%p1118_p2)
}
  0x4f   : > { %974 = dma.hbm_to_vmem [thread:$0]  (!%p1411_p6), %s1457_s26, 512, %s1459_s9, %s1463_s1, %s1695_s16, %s1695_s16, %s1697_s27  }
  0x50   : > { %s1491_s24 = sadd.s32 4294967295, %s1298_s23   ;;  %p90_p0 = scmp.ne.s32.totalorder %s1282_s19, %s1278_s18 }
  0x51   : > { %p1699_p3 = scmp.eq.s32.totalorder %s1491_s24, 0  ;;  %p855_p4 = scmp.ge.s32.totalorder %s1298_s23, 1 }
  0x52   : > { %p211_p5 = scmp.lt.s32.totalorder %s1298_s23, 11  ;;  %s1304_s9 = smov [#allocation3]  }
  0x53   : > { %p1500_p7 = por %p1699_p3, %p90_p0  ;;  %s226_s26 = sshll.u32 %s1304_s9, 4  ;;  %s1508_s26 = int_to_ptr.vmem [resolvable:$true] %s226_s26 }
  0x54   : > { %p1504_p9 = pnand %p855_p4, %p211_p5  ;;  %s1722_s2 = sld [smem:[#allocation22_spill]] }
  0x55   : > { %s1720_s12 = scalar_select %p1500_p7, 1, 0 }
  0x56   : > { %s1721_s14 = scalar_select %p1504_p9, 1, 0 }
  0x57   : > { %p961_p11 = pneg %p1504_p9  ;;  %s266_s28 = scalar_lea.vmem [#allocation8], %s1395_s6 }
  0x58   : > { %s274_s11 = sshll.u32 %s266_s28, 4  ;;  %s1525_s11 = int_to_ptr.vmem [resolvable:$true] %s274_s11 }
  0x59   : > { %p1521_p12 = pnand %p961_p11, %p1699_p3 }
  0x5a   : > { %s1516_s8 = scalar_lea.hbm %s1722_s2, %s1398_s7  ;;  %s1127_s29 = scalar_lea.hbm %s1722_s2, 2560 }
  0x5b   : > { %s1723_s25 = scalar_select %p1521_p12, 1, 0 }
  0x5c   : > { %s1122_s10 = scalar_lea.hbm %s1516_s8, 256  ;;  %p1128_p2 = scmp.lt.u32.totalorder %s1516_s8, %s1722_s2 }
  0x5d   : > { %p1123_p10 = scmp.ne.s32.totalorder %s1516_s8, %s1122_s10  ;;  %p1129_p0 = scmp.lt.u32.totalorder %s1127_s29, %s1122_s10 }
  0x5e   : > { %p1131_p5 = scmp.lt.u32.totalorder %s1122_s10, %s1516_s8 }
  0x5f   : > { %p1125_p13 = pnand %p1123_p10, %p1425_p8  ;;  %p1130_p4 = por %p1129_p0, %p1128_p2 }
  0x61   : > { %p1126_p1 = pneg %p1125_p13  ;;  %p1132_p11 = por %p1131_p5, %p1130_p4 }
  0x63   : > { %p1133_p3 = pnand %p1132_p11, %p1126_p1 }
  0x65   : > { %1136 = shalt.err (!%p1133_p3)
}
  0x66   : > { %s1137_s28 = scalar_lea.vmem %s1525_s11, 256  ;;  %s1305_s9 = smov [#allocation8]  }
  0x67   : > { %p1138_p10 = scmp.ne.s32.totalorder %s1525_s11, %s1137_s28  ;;  %s1142_s18 = sshll.u32 %s1305_s9, 4  ;;  %s1143_s18 = int_to_ptr.vmem [resolvable:$false] %s1142_s18 }
  0x68   : > { %s1144_s16 = scalar_lea.vmem %s1143_s18, 512  ;;  %p1145_p9 = scmp.lt.s32.totalorder %s1525_s11, %s1143_s18 }
  0x69   : > { %p1140_p13 = pnand %p1138_p10, %p1425_p8  ;;  %p1146_p12 = scmp.lt.s32.totalorder %s1144_s16, %s1137_s28 }
  0x6b   : > { %p1141_p7 = pneg %p1140_p13  ;;  %p1147_p2 = por %p1146_p12, %p1145_p9 }
  0x6d   : > { %p1148_p0 = pnand %p1147_p2, %p1141_p7 }
  0x6f   : > { %1151 = shalt.err (!%p1148_p0)
}
  0x70   : > { %s1724_s27 = smov 4   ;;  %s1725_s10 = smov 64  }
  0x71   : > { %971 = dma.hbm_to_vmem [thread:$0]  (!%p1411_p6), %s1516_s8, 256, %s1525_s11, %s1419_s15, %s1725_s10, %s1725_s10, %s1724_s27  }
  0x72   : > { %s1556_s2 = scalar_lea.hbm %s1692_s4, %s1398_s7  ;;  %s1152_s16 = scalar_lea.hbm %s1688_s0, 128 }
  0x73   : > { %p1153_p3 = scmp.ne.s32.totalorder %s1688_s0, %s1152_s16  ;;  %p1726_p7 = scmp.ne.s32.totalorder %s1723_s25, 0 }
  0x74   : > { %p1159_p4 = scmp.lt.u32.totalorder %s1152_s16, %s1688_s0 }
  0x75   : > { %p1154_p9 = pneg %p1726_p7 }
  0x77   : > { %p1155_p12 = pnand %p1154_p9, %p1153_p3 }
  0x79   : > { %p1156_p1 = pneg %p1155_p12 }
  0x7b   : > { %p1161_p5 = pnand %p1159_p4, %p1156_p1 }
  0x7d   : > { %1164 = shalt.err (!%p1161_p5)
}
  0x7e   : > { %s1165_s7 = scalar_lea.vmem %s1508_s26, 128  ;;  %p1173_p2 = scmp.lt.s32.totalorder %s1508_s26, %s1508_s26 }
  0x7f   : > { %p1166_p11 = scmp.ne.s32.totalorder %s1508_s26, %s1165_s7  ;;  %p1174_p0 = scmp.lt.s32.totalorder %s1165_s7, %s1165_s7 }
  0x81   : > { %p1168_p10 = pnand %p1166_p11, %p1154_p9  ;;  %p1175_p6 = por %p1174_p0, %p1173_p2 }
  0x83   : > { %p1169_p13 = pneg %p1168_p10 }
  0x85   : > { %p1176_p8 = pnand %p1175_p6, %p1169_p13 }
  0x87   : > { %1179 = shalt.err (!%p1176_p8)
}
  0x88   : > { %964 = dma.hbm_to_vmem [thread:$0]  (!%p1726_p7), %s1688_s0, 128, %s1508_s26, [#allocation4], %s1725_s10, %s1725_s10, %s1724_s27  }
  0x89   : > { %s311_s22 = scalar_lea.vmem [#allocation11], %s1395_s6  ;;  %s1180_s15 = scalar_lea.hbm %s1556_s2, 256 }
  0x8a   : > { %s320_s30 = sshll.u32 %s311_s22, 4  ;;  %p1181_p6 = scmp.ne.s32.totalorder %s1556_s2, %s1180_s15  ;;  %s1583_s30 = int_to_ptr.vmem [resolvable:$true] %s320_s30 }
  0x8b   : > { %p1727_p8 = scmp.ne.s32.totalorder %s1718_s17, 0  ;;  %s1185_s25 = scalar_lea.hbm %s1692_s4, 2560 }
  0x8c   : > { %p1186_p12 = scmp.lt.u32.totalorder %s1556_s2, %s1692_s4  ;;  %p1187_p1 = scmp.lt.u32.totalorder %s1185_s25, %s1180_s15 }
  0x8d   : > { %p1183_p3 = pnand %p1181_p6, %p1727_p8  ;;  %p1189_p7 = scmp.lt.u32.totalorder %s1180_s15, %s1556_s2 }
  0x8e   : > { %p1188_p4 = por %p1187_p1, %p1186_p12 }
  0x8f   : > { %p1184_p9 = pneg %p1183_p3 }
  0x90   : > { %p1190_p5 = por %p1189_p7, %p1188_p4 }
  0x92   : > { %p1191_p11 = pnand %p1190_p5, %p1184_p9 }
  0x94   : > { %1194 = shalt.err (!%p1191_p11)
}
  0x95   : > { %s1195_s6 = scalar_lea.vmem %s1583_s30, 256  ;;  %s1306_s26 = smov [#allocation11]  }
  0x96   : > { %p1196_p10 = scmp.ne.s32.totalorder %s1583_s30, %s1195_s6  ;;  %s1200_s27 = sshll.u32 %s1306_s26, 4  ;;  %s1201_s27 = int_to_ptr.vmem [resolvable:$false] %s1200_s27 }
  0x97   : > { %s1202_s10 = scalar_lea.vmem %s1201_s27, 512  ;;  %p1203_p0 = scmp.lt.s32.totalorder %s1583_s30, %s1201_s27 }
  0x98   : > { %p1198_p13 = pnand %p1196_p10, %p1727_p8  ;;  %p1204_p6 = scmp.lt.s32.totalorder %s1202_s10, %s1195_s6 }
  0x9a   : > { %p1199_p2 = pneg %p1198_p13  ;;  %p1205_p3 = por %p1204_p6, %p1203_p0 }
  0x9c   : > { %p1206_p12 = pnand %p1205_p3, %p1199_p2 }
  0x9e   : > { %1209 = shalt.err (!%p1206_p12)
}
  0x9f   : > { %s1307_s28 = smov 128   ;;  %s1308_s18 = smov 8  }
  0xa0   : > { %p1728_p9 = scmp.ne.s32.totalorder %s1717_s13, 0  ;;  %p1729_p8 = scmp.ne.s32.totalorder %s1721_s14, 0 }
  0xa1   : > { %p1730_p1 = scmp.eq.s32.totalorder (!%p1729_p8), %s1491_s24, 0 }
  0xa2   : > { %977 = dma.hbm_to_vmem [thread:$0]  (!%p1728_p9), %s1556_s2, 256, %s1583_s30, %s1463_s1, %s1307_s28, %s1307_s28, %s1308_s18  }
  0xa3   : > { %332 = sbr.rel (%p1729_p8) target bundleno = 699 (0x2bb), region = 40 }
  0xaa   : > { %1261 = dma.done.wait (%p1730_p1), [#allocation4], 128   ;;  %p1731_p4 = pmov %p1730_p1 }
  0xab   : > { %s338_s17 = sand.u32 1, %s1491_s24   ;;  %s340_s16 = sand.u32 1, %s1282_s19  }
  0xac   : > { %1263 = vsyncadd (%p1731_p4), [#allocation4], 4294967168  ;;  %s1615_s7 = sshll.u32 %s340_s16, 4  ;;  %s339_s3 = scalar_lea.sflag [#allocation7], %s338_s17 }
  0xad   : > { %s342_s13 = scalar_lea.vmem [#allocation6], %s1615_s7  ;;  %p1732_p7 = scmp.ne.s32.totalorder %s1720_s12, 0 }
  0xaf   : > { %1265 = dma.done.wait (%p1732_p7), %s339_s3, 512  }
  0xb0   : > { %1267 = vsyncadd (%p1732_p7), %s339_s3, 4294966784  ;;  %s874_s1 = sshll.u32 %s340_s16, 5  ;;  %s351_s2 = scalar_lea.vmem [#allocation8], %s1615_s7 }
  0xb1   : > { %s357_s14 = scalar_lea.sflag [#allocation10], %s338_s17  ;;  %s1623_s20 = scalar_lea.vmem [#allocation9], %s874_s1 }
  0xb2   : > { %1269 = dma.done.wait (%p1732_p7), %s357_s14, 768  }
  0xb3   : > { %1271 = vsyncadd (%p1732_p7), %s357_s14, 4294966528  ;;  %p411_p5 = scmp.eq.s32.totalorder %s1290_s21, 0  ;;  %s369_s22 = scalar_lea.vmem [#allocation11], %s1615_s7 }
  0xb4   : > { %vm417_vm0 = vcmask (%p411_p5), 261120   ;;  %v1309_v0 = vmov (%p411_p5), 0.0  }
  0xb5   : > { %416 = sbr.rel (!%p411_p5) target bundleno = 188 (0xbc), region = 64  ;;  %418 = vst.msk [vmem:[#allocation2] sm:$0xff] (%p411_p5), %vm417_vm0, %v1309_v0  ;;  %419 = vst.msk [vmem:[#allocation2 + $0x8] sm:$0xff] (%p411_p5), %vm417_vm0, %v1309_v0 }
  0xbc PF: > { %v1045_v1 = vld [vmem:[%s342_s13] sm:$0xff]   ;;  %v1310_v2 = vmov 0.0   ;;  %v1046_v3 = vld [vmem:[%s342_s13 + $0x8] sm:$0xff]   ;;  %vm1311_vm1 = vmmov 0   ;;  %v1312_v6 = vmov 0   ;;  %vm457_vm2 = vcmask 261120  }
  0xbd   : > { %917 = vmatprep.subr.bf16.mxu1 %v1310_v2  ;;  %933 = vmatprep.subr.bf16.mxu0 %v1310_v2  ;;  %v1047_v4 = vld [vmem:[#allocation3] sm:$0xff]   ;;  %v1048_v5 = vld [vmem:[%s351_s2] sm:$0xff]   ;;  %v1051_v13 = vld [vmem:[%s1623_s20 + $0x8] sm:$0xff]   ;;  %vm624_vm7 = vcmask 523264   ;;  %p673_p11 = scmp.eq.s32.totalorder %s1290_s21, 9 }
  0xbe   : > { %918 = vmatpush3.bf16.msra.mxu1 %v1045_v1  ;;  %921 = vmatprep.mubr.msk.bf16.mxu1 %vm1311_vm1, %v1310_v2  ;;  %v438_v7 = vld [vmem:[%s369_s22] sm:$0xff]  ;;  %v439_v8 = vld [vmem:[%s369_s22 + $0x8] sm:$0xff]  ;;  %vm688_vm8 = vcmask (%p673_p11), 257024  }
  0xbf   : > { %919 = vmatprep.subr.bf16.mxu1 %v1310_v2  ;;  %941 = vmatprep.mubr.msk.bf16.mxu0 %vm1311_vm1, %v1310_v2  ;;  %vm571_vm3 = vcmp.ne.f32.partialorder %v438_v7, 0.0  ;;  %vm572_vm4 = vcmp.ne.f32.partialorder %v439_v8, 0.0  ;;  %v1049_v11 = vld [vmem:[%s351_s2 + $0x8] sm:$0xff]   ;;  %v1050_v12 = vld [vmem:[%s1623_s20] sm:$0xff]   ;;  %v1052_v14 = vld [vmem:[%s1623_s20 + $0x10] sm:$0xff]  }
  0xc0   : > { %1043 = vset.pattern.permute.xlu0 %v1312_v6  ;;  %1044 = vset.pattern.permute.xlu1 %v1312_v6  ;;  %v585_v9 = vsel %vm571_vm3, 1, %v1312_v6  ;;  %v586_v10 = vsel %vm572_vm4, 1, %v1312_v6  ;;  %v1053_v15 = vld [vmem:[%s1623_s20 + $0x18] sm:$0xff]   ;;  %v598_v45 = vld [vmem:[#allocation2] sm:$0xff]  ;;  %v599_v47 = vld [vmem:[#allocation2 + $0x8] sm:$0xff] }
  0xc1   : > { %575 = vperm.xlu0 %1043, %v438_v7   ;;  %588 = vperm.xlu1 %1044, %v585_v9  }
  0xc2   : > { %920 = vmatpush3.bf16.msra.mxu1 %v1046_v3  ;;  %934 = vmatpush3.bf16.msra.mxu0 %v1050_v12 }
  0xc3   : > { %925 = vmatprep.subr.bf16.mxu1 %v1310_v2  ;;  %935 = vmatprep.subr.bf16.mxu0 %v1310_v2 }
  0xc5   : > { %922 = vmatmul.mubr.msk.bf16.vlgmr.msra.gmra.mrb[0].mxu1 %vm457_vm2, %v1047_v4  ;;  %580 = vperm.xlu0 %1043, %v439_v8  }
  0xc6   : > { %926 = vmatpush3.bf16.msra.mxu1 %v1048_v5  ;;  %929 = vmatprep.mubr.msk.bf16.mxu1 %vm1311_vm1, %v1310_v2 }
  0xc7   : > { %927 = vmatprep.subr.bf16.mxu1 %v1310_v2  ;;  %591 = vperm.xlu1 %1044, %v586_v10  }
  0xc8   : > { %936 = vmatpush3.bf16.msra.mxu0 %v1051_v13 }
  0xc9   : > { %937 = vmatprep.subr.bf16.mxu0 %v1310_v2 }
  0xca   : > { %928 = vmatpush3.bf16.msra.mxu1 %v1049_v11 }
  0xcc   : > { %938 = vmatpush3.bf16.msra.mxu0 %v1052_v14 }
  0xcd   : > { %930 = vmatmul.mubr.msk.bf16.vlgmr.msra.gmra.mrb[4].mxu1 %vm457_vm2, %v1047_v4  ;;  %939 = vmatprep.subr.bf16.mxu0 %v1310_v2 }
  0xd0   : > { %940 = vmatpush3.bf16.msra.mxu0 %v1053_v15 }
 0x140   : > { %v589_v30 = vpop.permute.xlu1 %588  ;;  %v576_v32 = vpop.permute.xlu0 %575 }
 0x141   : > { %vm593_vm5 = vcmp.eq.s32.totalorder %v589_v30, 1 }
 0x144   : > { %v581_v40 = vpop.permute.xlu0 %580 }
 0x146   : > { %v592_v39 = vpop.permute.xlu1 %591 }
 0x147   : > { %vm594_vm6 = vcmp.eq.s32.totalorder %v592_v39, 1 }
 0x198   : > { %v495_v16 = vpop.f32.mrb[0].mxu1 }
 0x199   : > { %v884_v17 = vmul.f32 -1.442695, %v495_v16  ;;  %v923_v18 = vpop.f32.mrb[1].mxu1 }
 0x19a   : > { %v498_v19 = vpop.f32.mrb[2].mxu1 }
 0x19b   : > { %1054 = vpow2.f32 %v884_v17  ;;  %v885_v20 = vmul.f32 -1.442695, %v498_v19  ;;  %v924_v21 = vpop.f32.mrb[3].mxu1 }
 0x19d   : > { %1056 = vpow2.f32 %v885_v20 }
 0x1a0   : > { %v548_v22 = vpop.f32.mrb[4].mxu1 }
 0x1a1   : > { %v931_v23 = vpop.f32.mrb[5].mxu1 }
 0x1a2   : > { %v551_v24 = vpop.f32.mrb[6].mxu1 }
 0x1a3   : > { %v932_v25 = vpop.f32.mrb[7].mxu1 }
 0x1a5   : > { %v1055_v26 = vpop.eup %1054 }
 0x1a6   : > { %v561_v27 = vadd.f32 1.0, %v1055_v26 }
 0x1a7   : > { %v1057_v28 = vpop.eup %1056 }
 0x1a8   : > { %1058 = vrcp.f32 %v561_v27  ;;  %v562_v29 = vadd.f32 1.0, %v1057_v28 }
 0x1aa   : > { %1060 = vrcp.f32 %v562_v29 }
 0x1b2   : > { %v1059_v31 = vpop.eup %1058 }
 0x1b3   : > { %v567_v33 = vmul.f32 %v1059_v31, %v495_v16 }
 0x1b4   : > { %v1061_v34 = vpop.eup %1060 }
 0x1b5   : > { %v568_v35 = vmul.f32 %v1061_v34, %v498_v19  ;;  %v569_v36 = vmul.f32 %v567_v33, %v548_v22 }
 0x1b7   : > { %v583_v37 = vmul.f32 %v576_v32, %v569_v36  ;;  %v570_v38 = vmul.f32 %v568_v35, %v551_v24 }
 0x1b9   : > { %v584_v41 = vmul.f32 %v581_v40, %v570_v38  ;;  %v595_v42 = vsel %vm593_vm5, %v583_v37, 0.0 }
 0x1bb   : > { %v596_v43 = vsel %vm594_vm6, %v584_v41, 0.0 }
 0x1bc   : > { %v597_v44 = vpack.c.bf16 %v596_v43, %v595_v42 }
 0x1be   : > { %942 = vmatmul.mubr.msk.bf16.vlgmr.msra.gmra.mrb[0].mxu0 %vm624_vm7, %v597_v44 }
 0x290   : > { %677 = sbr.rel (!%p673_p11) target bundleno = 673 (0x2a1), region = 68 }
 0x291   : > { %v662_v46 = vpop.f32.mrb[0].mxu0 }
 0x292   : > { %v669_v48 = vadd.f32 %v662_v46, %v598_v45  ;;  %v943_v49 = vpop.f32.mrb[1].mxu0 }
 0x293   : > { %v665_v50 = vpop.f32.mrb[2].mxu0 }
 0x294   : > { %671 = vst.msk [vmem:[#allocation2] sm:$0xff] %vm457_vm2, %v669_v48  ;;  %v670_v51 = vadd.f32 %v665_v50, %v599_v47  ;;  %v944_v52 = vpop.f32.mrb[3].mxu0 }
 0x296   : > { %672 = vst.msk [vmem:[#allocation2 + $0x8] sm:$0xff] %vm457_vm2, %v670_v51 }
 0x29b   : > { %v678_v53 = vld [vmem:[#allocation2] sm:$0xff] }
 0x29c   : > { %v904_v55 = vpack.c.bf16 %v678_v53, %v678_v53 }
 0x29d   : > { %v679_v54 = vld [vmem:[#allocation2 + $0x8] sm:$0xff] }
 0x29e   : > { %v905_v56 = vpack.c.bf16 %v679_v54, %v679_v54  ;;  %689 = vst.msk [vmem:[#allocation12] sm:$0xf] %vm688_vm8, %v904_v55 }
 0x2a0   : > { %690 = vst.msk [vmem:[#allocation12 + $0x4] sm:$0xf] %vm688_vm8, %v905_v56 }
 0x2a1 PF: > { %p981_p10 = scmp.eq.s32.totalorder %s1491_s24, 9  ;;  %s1313_s21 = smov [#allocation12]  }
 0x2a2   : > { %s700_s12 = sshll.u32 %s1313_s21, 4  ;;  %s701_s12 = int_to_ptr.vmem [resolvable:$true] %s700_s12 }
 0x2a3   : > { %s1210_s30 = scalar_lea.vmem %s701_s12, 128  ;;  %p1217_p6 = scmp.lt.s32.totalorder %s701_s12, %s701_s12 }
 0x2a4   : > { %p1211_p13 = scmp.ne.s32.totalorder %s701_s12, %s1210_s30  ;;  %p1218_p3 = scmp.lt.s32.totalorder %s1210_s30, %s1210_s30 }
 0x2a6   : > { %p1212_p2 = pnand %p1211_p13, %p981_p10  ;;  %p1219_p12 = por %p1218_p3, %p1217_p6 }
 0x2a8   : > { %p1213_p0 = pneg %p1212_p2 }
 0x2aa   : > { %p1220_p9 = pnand %p1219_p12, %p1213_p0 }
 0x2ac   : > { %1223 = shalt.err (!%p1220_p9)
}
 0x2ad   : > { %s1224_s11 = scalar_lea.hbm %s1693_s5, 128 }
 0x2ae   : > { %p1225_p8 = scmp.ne.s32.totalorder %s1693_s5, %s1224_s11  ;;  %p1230_p7 = scmp.lt.u32.totalorder %s1224_s11, %s1693_s5 }
 0x2b0   : > { %p1226_p1 = pnand %p1225_p8, %p981_p10 }
 0x2b2   : > { %p1227_p4 = pneg %p1226_p1 }
 0x2b4   : > { %p1232_p5 = pnand %p1230_p7, %p1227_p4 }
 0x2b6   : > { %1235 = shalt.err (!%p1232_p5)
}
 0x2b7   : > { %s1314_s26 = smov 64   ;;  %s1315_s27 = smov 4  }
 0x2b8   : > { %958 = dma.vmem_to_hbm [thread:$0]  (%p981_p10), %s701_s12, 128, %s1693_s5, [#allocation5], %s1314_s26, %s1314_s26, %s1315_s27  }
 0x2b9   : > { %1273 = dma.done.wait (%p981_p10), [#allocation5], 128  }
 0x2ba   : > { %1275 = vsyncadd (%p981_p10), [#allocation5], 4294967168 }
 0x2bb PF: > { %s23_s23 = sadd.s32 1, %s1298_s23   ;;  %s1733_s17 = sld [smem:[#allocation17_spill]] }
 0x2bc   : > { %p20_p11 = scmp.ge.s32.totalorder %s23_s23, 12   ;;  %s1734_s20 = sld [smem:[#allocation20_spill]] }
 0x2bd   : > { %s1735_s21 = sld [smem:[#allocation18_spill]]  ;;  %s1736_s22 = sld [smem:[#allocation19_spill]] }
 0x2be   : > { %s1737_s18 = smov %s1282_s19  ;;  %22 = sbr.rel (!%p20_p11) target bundleno = 12 (0xc), region = 127 }
 0x2c1   : > { %s1738_s19 = smov %s1733_s17 }
 0x2c5   :  { %716 = vsyncpa [#allocation4], 1 }
 0x2c6   :  { %718 = vsyncpa [#allocation4 + $0x1], 1 }
 0x2c7   :  { %719 = vsyncpa [#allocation7], 1 }
 0x2c8   :  { %721 = vsyncpa [#allocation7 + $0x1], 1 }
 0x2c9   :  { %722 = vsyncpa [#allocation10], 1 }
 0x2ca   :  { %724 = vsyncpa [#allocation10 + $0x1], 1 }
 0x2cb   :  { %725 = vsyncpa [#allocation5], 1 }
 0x2cc   :  { %727 = vsyncpa [#allocation5 + $0x1], 1 }

</bundles_post_ra>
